<compile_context>
chip_gen: v7x
topology: tpu7x:2x2x1
jax: 0.10.0
libtpu: 0.0.40
codegen_flags: <defaults>
</compile_context>

<pallas_src>
import jax
import jax.numpy as jnp
from jax.experimental import pallas as pl
from jax.experimental.pallas import tpu as pltpu

HIDDEN_SIZE = 128
OUTPUT_SIZE = 256   # vocab size


def decoder_gru_kernel(tok_ref, emb_hbm, h_ref, wg_ref, bg_ref, wout_ref, bout_ref,
                       logp_ref, hnew_ref, x_buf, dma_sem):
    H = h_ref.shape[1]

    # In-kernel embedding gather: DMA the single needed (1, H) row from HBM to VMEM.
    tok = tok_ref[0]
    cp = pltpu.make_async_copy(emb_hbm.at[pl.ds(tok, 1)], x_buf, dma_sem)
    cp.start()
    cp.wait()

    # F.relu(embedding(input).view(1, 1, -1))
    x = jnp.maximum(x_buf[...], 0.0)              # (1, H) f32
    h = h_ref[...]                                # (1, H) f32

    # Fused GRU matmul: [x, h] (1, 2H) @ W_g (2H, 4H); bf16 operands, f32 accumulation.
    # W_g column blocks: [ W_ir^T;W_hr^T | W_iz^T;W_hz^T | W_in^T;0 | 0;W_hn^T ]
    xh = jnp.concatenate([x, h], axis=1).astype(jnp.bfloat16)     # (1, 2H)
    gates = jnp.dot(xh, wg_ref[...], preferred_element_type=jnp.float32) + bg_ref[...]

    rz = jax.nn.sigmoid(gates[:, 0:2 * H])        # r, z (input+hidden parts pre-summed)
    r = rz[:, 0:H]
    z = rz[:, H:2 * H]
    i_n = gates[:, 2 * H:3 * H]
    h_n = gates[:, 3 * H:4 * H]
    n = jnp.tanh(i_n + r * h_n)
    h_new = (1.0 - z) * n + z * h                 # PyTorch GRU update
    hnew_ref[...] = h_new

    # Linear(out) + LogSoftmax(dim=1), all in f32 after the bf16 matmul.
    logits = jnp.dot(h_new.astype(jnp.bfloat16), wout_ref[...],
                     preferred_element_type=jnp.float32) + bout_ref[...]
    m = jnp.max(logits, axis=1, keepdims=True)
    lse = m + jnp.log(jnp.sum(jnp.exp(logits - m), axis=1, keepdims=True))
    logp_ref[...] = logits - lse


@jax.jit
def decoder_gru_step(token, hidden, params):
    """token: int (1,1); hidden: f32 (1,1,H). Returns (log_probs (1,O), hidden (1,1,H))."""
    emb = params["embedding"]        # (O, H)  f32, stays in HBM (only 1 row is DMA'd)
    wg = params["w_gates_t"]         # (2H,4H) bf16, pre-transposed + fused
    bg = params["b_gates"]           # (1, 4H) f32
    wout = params["w_out_t"]         # (H, O)  bf16, pre-transposed
    bout = params["b_out"]           # (1, O)  f32
    O, H = emb.shape

    tok = token.reshape((1,)).astype(jnp.int32)
    h = hidden.reshape(1, H)

    vmem = pl.BlockSpec(memory_space=pltpu.MemorySpace.VMEM)
    smem = pl.BlockSpec(memory_space=pltpu.MemorySpace.SMEM)
    hbm = pl.BlockSpec(memory_space=pl.ANY)

    cost = pl.CostEstimate(
        flops=2 * (2 * H * 4 * H + H * O),
        transcendentals=2 * H + H + O + 1,                     # sigmoid + tanh + exp + log
        bytes_accessed=(wg.size * 2 + wout.size * 2            # bf16 weights
                        + bg.size * 4 + bout.size * 4          # f32 biases
                        + H * 4                                # embedding row
                        + 2 * H * 4                            # hidden in/out
                        + O * 4),                              # log-probs out
    )

    logp, h_new = pl.pallas_call(
        decoder_gru_kernel,
        out_shape=(jax.ShapeDtypeStruct((1, O), jnp.float32),
                   jax.ShapeDtypeStruct((1, H), jnp.float32)),
        in_specs=[smem, hbm, vmem, vmem, vmem, vmem, vmem],
        out_specs=(vmem, vmem),
        scratch_shapes=[pltpu.VMEM((1, H), jnp.float32),
                        pltpu.SemaphoreType.DMA(())],
        input_output_aliases={2: 1},      # hidden input buffer reused for new hidden
        cost_estimate=cost,
    )(tok, emb, h, wg, bg, wout, bout)

    return logp, h_new.reshape(1, 1, H)


def init_params(key, hidden_size, output_size):
    """Raw PyTorch-layout parameters (nn.Embedding / nn.GRU / nn.Linear, gate order r,z,n)."""
    ks = jax.random.split(key, 7)
    bound = 1.0 / jnp.sqrt(hidden_size)
    u = lambda k, shape: jax.random.uniform(k, shape, jnp.float32, -bound, bound)
    return {
        "embedding": jax.random.normal(ks[0], (output_size, hidden_size), jnp.float32),
        "w_ih": u(ks[1], (3 * hidden_size, hidden_size)),
        "w_hh": u(ks[2], (3 * hidden_size, hidden_size)),
        "b_ih": u(ks[3], (3 * hidden_size,)),
        "b_hh": u(ks[4], (3 * hidden_size,)),
        "w_out": u(ks[5], (output_size, hidden_size)),
        "b_out": u(ks[6], (output_size,)),
    }


def pack_params(raw):
    """One-time packing: pre-transpose, fuse GRU weights into (2H,4H), cast weights to bf16."""
    H = raw["w_hh"].shape[1]
    w_ih_t = raw["w_ih"].T                       # (H, 3H)
    w_hh_t = raw["w_hh"].T                       # (H, 3H)
    zeros = jnp.zeros((H, H), jnp.float32)
    top = jnp.concatenate([w_ih_t[:, 0:H], w_ih_t[:, H:2 * H], w_ih_t[:, 2 * H:], zeros], axis=1)
    bot = jnp.concatenate([w_hh_t[:, 0:H], w_hh_t[:, H:2 * H], zeros, w_hh_t[:, 2 * H:]], axis=1)
    w_gates_t = jnp.concatenate([top, bot], axis=0).astype(jnp.bfloat16)   # (2H, 4H)
    b_gates = jnp.concatenate([
        raw["b_ih"][0:2 * H] + raw["b_hh"][0:2 * H],    # r, z biases pre-summed
        raw["b_ih"][2 * H:3 * H],                       # i_n bias
        raw["b_hh"][2 * H:3 * H],                       # h_n bias
    ])[None, :].astype(jnp.float32)                     # (1, 4H)
    return {
        "embedding": raw["embedding"],
        "w_gates_t": w_gates_t,
        "b_gates": b_gates,
        "w_out_t": raw["w_out"].T.astype(jnp.bfloat16),        # (H, O)
        "b_out": raw["b_out"][None, :].astype(jnp.float32),    # (1, O)
    }


def reference_step(token, hidden, raw):
    """Pure-JAX f32 reference matching the PyTorch forward exactly."""
    H = raw["w_hh"].shape[1]
    x = jnp.maximum(raw["embedding"][token.reshape(())][None, :], 0.0)
    h = hidden.reshape(1, H)
    gi = x @ raw["w_ih"].T + raw["b_ih"][None, :]
    gh = h @ raw["w_hh"].T + raw["b_hh"][None, :]
    i_r, i_z, i_n = gi[:, 0:H], gi[:, H:2 * H], gi[:, 2 * H:]
    h_r, h_z, h_n = gh[:, 0:H], gh[:, H:2 * H], gh[:, 2 * H:]
    r = jax.nn.sigmoid(i_r + h_r)
    z = jax.nn.sigmoid(i_z + h_z)
    n = jnp.tanh(i_n + r * h_n)
    h_new = (1.0 - z) * n + z * h
    logits = h_new @ raw["w_out"].T + raw["b_out"][None, :]
    return jax.nn.log_softmax(logits, axis=1), h_new.reshape(1, 1, H)


if __name__ == "__main__":
    key = jax.random.PRNGKey(0)
    raw = init_params(key, HIDDEN_SIZE, OUTPUT_SIZE)
    params = pack_params(raw)

    tok = jnp.array([[7]], dtype=jnp.int32)                       # input token index (1,1)
    h_k = jnp.zeros((1, 1, HIDDEN_SIZE), dtype=jnp.float32)       # init_hidden()
    h_r = h_k

    for _ in range(3):                                            # a few chained decode steps
        logp_k, h_k = decoder_gru_step(tok, h_k, params)
        logp_r, h_r = reference_step(tok, h_r, raw)
        jax.block_until_ready((logp_k, h_k))

        assert logp_k.shape == (1, OUTPUT_SIZE)
        assert h_k.shape == (1, 1, HIDDEN_SIZE)
        # log-softmax sanity: probabilities sum to ~1
        assert abs(float(jnp.sum(jnp.exp(logp_k))) - 1.0) < 1e-3
        # bf16-weight drift vs f32 reference stays small
        assert float(jnp.max(jnp.abs(logp_k - logp_r))) < 5e-2
        assert float(jnp.max(jnp.abs(h_k - h_r))) < 5e-2

        tok = jnp.argmax(logp_k, axis=1).reshape(1, 1).astype(jnp.int32)  # greedy next token

    print("KERNEL_OK")
</pallas_src>

<mosaic_0001>
module attributes {stable_mosaic.version = 11 : i64} {
  func.func @decoder_gru_kernel(%arg0: memref<1xi32, #tpu.memory_space<smem>>, %arg1: memref<256x128xf32, #tpu.memory_space<any>>, %arg2: memref<1x128xf32, #tpu.memory_space<vmem>>, %arg3: memref<256x512xbf16, #tpu.memory_space<vmem>>, %arg4: memref<1x512xf32, #tpu.memory_space<vmem>>, %arg5: memref<128x256xbf16, #tpu.memory_space<vmem>>, %arg6: memref<1x256xf32, #tpu.memory_space<vmem>>, %arg7: memref<1x256xf32, #tpu.memory_space<vmem>>, %arg8: memref<1x128xf32, #tpu.memory_space<vmem>>, %arg9: memref<1x128xf32, #tpu.memory_space<vmem>>, %arg10: memref<!tpu.dma_semaphore, #tpu.memory_space<semaphore_mem>>) attributes {dimension_semantics = [], scalar_prefetch = 0 : i64, scratch_operands = 2 : i64, tpu.core_type = #tpu.core_type<tc>} {
    %c0 = arith.constant 0 : index
    %0 = memref.load %arg0[%c0] : memref<1xi32, #tpu.memory_space<smem>>
    %c0_i32 = arith.constant 0 : i32
    %1 = tpu.memref_slice %arg1[%0, %c0_i32] : memref<256x128xf32, #tpu.memory_space<any>> -> memref<1x128xf32, #tpu.memory_space<any>>
    tpu.enqueue_dma source(%1 : memref<1x128xf32, #tpu.memory_space<any>>) target(%arg9 : memref<1x128xf32, #tpu.memory_space<vmem>>) target_semaphore(%arg10 : memref<!tpu.dma_semaphore, #tpu.memory_space<semaphore_mem>>)
    %c0_i32_0 = arith.constant 0 : i32
    %2 = tpu.memref_slice %arg1[%0, %c0_i32_0] : memref<256x128xf32, #tpu.memory_space<any>> -> memref<1x128xf32, #tpu.memory_space<any>>
    tpu.wait_dma2 semaphore(%arg10 : memref<!tpu.dma_semaphore, #tpu.memory_space<semaphore_mem>>) src(%2 : memref<1x128xf32, #tpu.memory_space<any>>) dst(%arg9 : memref<1x128xf32, #tpu.memory_space<vmem>>)
    %c0_1 = arith.constant 0 : index
    %c0_2 = arith.constant 0 : index
    %3 = vector.load %arg9[%c0_1, %c0_2] : memref<1x128xf32, #tpu.memory_space<vmem>>, vector<1x128xf32>
    %cst = arith.constant 0.000000e+00 : f32
    %4 = vector.broadcast %cst : f32 to vector<1x128xf32>
    %5 = arith.maximumf %3, %4 : vector<1x128xf32>
    %c0_3 = arith.constant 0 : index
    %c0_4 = arith.constant 0 : index
    %6 = vector.load %arg2[%c0_3, %c0_4] : memref<1x128xf32, #tpu.memory_space<vmem>>, vector<1x128xf32>
    %7 = tpu.concatenate %5, %6 in 1 : vector<1x128xf32>, vector<1x128xf32> -> vector<1x256xf32>
    %8 = arith.truncf %7 : vector<1x256xf32> to vector<1x256xbf16>
    %c0_5 = arith.constant 0 : index
    %c0_6 = arith.constant 0 : index
    %9 = vector.load %arg3[%c0_5, %c0_6] : memref<256x512xbf16, #tpu.memory_space<vmem>>, vector<256x512xbf16>
    %cst_7 = arith.constant dense<0.000000e+00> : vector<1x512xf32>
    %10 = tpu.matmul %8, %9, %cst_7 {dimension_numbers = #tpu.dot_dimension_numbers<[1], [0], [0], [1], [0, 0, 1, 1], [], []>} : vector<1x256xbf16>, vector<256x512xbf16>, vector<1x512xf32> -> vector<1x512xf32>
    %c0_8 = arith.constant 0 : index
    %c0_9 = arith.constant 0 : index
    %11 = vector.load %arg4[%c0_8, %c0_9] : memref<1x512xf32, #tpu.memory_space<vmem>>, vector<1x512xf32>
    %12 = arith.addf %10, %11 : vector<1x512xf32>
    %13 = vector.extract_strided_slice %12 {offsets = [0, 0], sizes = [1, 256], strides = [1, 1]} : vector<1x512xf32> to vector<1x256xf32>
    %14 = arith.negf %13 : vector<1x256xf32>
    %15 = math.exp %14 : vector<1x256xf32>
    %cst_10 = arith.constant 1.000000e+00 : f32
    %16 = vector.broadcast %cst_10 : f32 to vector<1x256xf32>
    %17 = arith.addf %16, %15 : vector<1x256xf32>
    %18 = arith.divf %16, %17 : vector<1x256xf32>
    %19 = vector.extract_strided_slice %18 {offsets = [0, 0], sizes = [1, 128], strides = [1, 1]} : vector<1x256xf32> to vector<1x128xf32>
    %20 = vector.extract_strided_slice %18 {offsets = [0, 128], sizes = [1, 128], strides = [1, 1]} : vector<1x256xf32> to vector<1x128xf32>
    %21 = vector.extract_strided_slice %12 {offsets = [0, 256], sizes = [1, 128], strides = [1, 1]} : vector<1x512xf32> to vector<1x128xf32>
    %22 = vector.extract_strided_slice %12 {offsets = [0, 384], sizes = [1, 128], strides = [1, 1]} : vector<1x512xf32> to vector<1x128xf32>
    %23 = arith.mulf %19, %22 : vector<1x128xf32>
    %24 = arith.addf %21, %23 : vector<1x128xf32>
    %25 = math.tanh %24 : vector<1x128xf32>
    %cst_11 = arith.constant 1.000000e+00 : f32
    %26 = vector.broadcast %cst_11 : f32 to vector<1x128xf32>
    %27 = arith.subf %26, %20 : vector<1x128xf32>
    %28 = arith.mulf %27, %25 : vector<1x128xf32>
    %29 = arith.mulf %20, %6 : vector<1x128xf32>
    %30 = arith.addf %28, %29 : vector<1x128xf32>
    %c0_12 = arith.constant 0 : index
    %c0_13 = arith.constant 0 : index
    %31 = vector.load %arg8[%c0_12, %c0_13] : memref<1x128xf32, #tpu.memory_space<vmem>>, vector<1x128xf32>
    tpu.vector_store %arg8[%c0_12, %c0_13], %30 {strides = array<i32>} : memref<1x128xf32, #tpu.memory_space<vmem>>, vector<1x128xf32>,
    %32 = arith.truncf %30 : vector<1x128xf32> to vector<1x128xbf16>
    %c0_14 = arith.constant 0 : index
    %c0_15 = arith.constant 0 : index
    %33 = vector.load %arg5[%c0_14, %c0_15] : memref<128x256xbf16, #tpu.memory_space<vmem>>, vector<128x256xbf16>
    %cst_16 = arith.constant dense<0.000000e+00> : vector<1x256xf32>
    %34 = tpu.matmul %32, %33, %cst_16 {dimension_numbers = #tpu.dot_dimension_numbers<[1], [0], [0], [1], [0, 0, 1, 1], [], []>} : vector<1x128xbf16>, vector<128x256xbf16>, vector<1x256xf32> -> vector<1x256xf32>
    %c0_17 = arith.constant 0 : index
    %c0_18 = arith.constant 0 : index
    %35 = vector.load %arg6[%c0_17, %c0_18] : memref<1x256xf32, #tpu.memory_space<vmem>>, vector<1x256xf32>
    %36 = arith.addf %34, %35 : vector<1x256xf32>
    %cst_19 = arith.constant dense<0xFF800000> : vector<1xf32>
    %37 = vector.multi_reduction <maximumf>, %36, %cst_19 [1] : vector<1x256xf32> to vector<1xf32>
    %38 = vector.shape_cast %37 : vector<1xf32> to vector<1x1xf32>
    %39 = vector.broadcast %38 : vector<1x1xf32> to vector<1x256xf32>
    %40 = arith.subf %36, %39 : vector<1x256xf32>
    %41 = math.exp %40 : vector<1x256xf32>
    %cst_20 = arith.constant dense<0.000000e+00> : vector<1xf32>
    %42 = vector.multi_reduction <add>, %41, %cst_20 [1] : vector<1x256xf32> to vector<1xf32>
    %43 = vector.shape_cast %42 : vector<1xf32> to vector<1x1xf32>
    %44 = math.log %43 : vector<1x1xf32>
    %45 = arith.addf %38, %44 : vector<1x1xf32>
    %46 = vector.broadcast %45 : vector<1x1xf32> to vector<1x256xf32>
    %47 = arith.subf %36, %46 : vector<1x256xf32>
    %c0_21 = arith.constant 0 : index
    %c0_22 = arith.constant 0 : index
    %48 = vector.load %arg7[%c0_21, %c0_22] : memref<1x256xf32, #tpu.memory_space<vmem>>, vector<1x256xf32>
    tpu.vector_store %arg7[%c0_21, %c0_22], %47 {strides = array<i32>} : memref<1x256xf32, #tpu.memory_space<vmem>>, vector<1x256xf32>,
    return
  }
}

</mosaic_0001>

<bundles_post_ra>
// kernel: decoder_gru_step.1
= control target key start
LH: loop header
LB: loop body
LE: loop exit
PB: predicated region body
PF: predicated region fallthrough
CT: control target
= control target key end

     0   :  { %15 = vsyncpa [#allocation6], 0  ;;  %s1271_s0 = inlined_call_operand.<no memory space> [shape: s32[1], index: 0, kind: input, shape index: {}]   ;;  %s1272_s1 = inlined_call_operand.hbm [shape: f32[256,128], index: 1, kind: input, shape index: {}]   ;;  %s1273_s2 = inlined_call_operand.vmem [shape: f32[1,128], index: 2, kind: input, shape index: {}, may-alias: {2,8}]   ;;  %s1274_s3 = inlined_call_operand.hbm [shape: bf16[256,512], index: 3, kind: input, shape index: {}]   ;;  %s1275_s4 = inlined_call_operand.vmem [shape: f32[1,512], index: 4, kind: input, shape index: {}]   ;;  %s1276_s5 = inlined_call_operand.hbm [shape: bf16[128,256], index: 5, kind: input, shape index: {}]   ;;  %s1277_s6 = inlined_call_operand.vmem [shape: f32[1,256], index: 6, kind: input, shape index: {}]   ;;  %s1278_s7 = inlined_call_operand.hbm [shape: f32[1,256], index: 7, kind: output, shape index: {0}]   ;;  %s1279_s8 = inlined_call_operand.vmem [shape: f32[1,128], index: 8, kind: output, shape index: {1}, may-alias: {2,8}]  }
   0x1   :  { %16 = vsyncpa [#allocation9], 0 }
   0x2   :  { %17 = vsyncpa [#allocation7], 0  ;;  %s1138_s27 = smov [#allocation5]   ;;  %s1040_s9 = scalar_lea.hbm %s1274_s3, 8192 }
   0x3   :  { %s27_s28 = sshll.u32 %s1138_s27, 4  ;;  %p1041_p0 = scmp.ne.s32.totalorder %s1274_s3, %s1040_s9  ;;  %s28_s28 = int_to_ptr.vmem [resolvable:$true] %s27_s28 }
   0x4   :  { %p1044_p1 = scmp.lt.u32.totalorder %s1040_s9, %s1274_s3 }
   0x6   :  { %p1046_p2 = pnand %p1044_p1, %p1041_p0 }
   0x8   :  { %1049 = shalt.err (!%p1046_p2)
}
   0x9   :  { %s1050_s14 = scalar_lea.vmem %s28_s28, 8192  ;;  %p1055_p4 = scmp.lt.s32.totalorder %s28_s28, %s28_s28 }
   0xa   :  { %p1051_p3 = scmp.ne.s32.totalorder %s28_s28, %s1050_s14  ;;  %p1056_p5 = scmp.lt.s32.totalorder %s1050_s14, %s1050_s14 }
   0xc   :  { %p1057_p6 = por %p1056_p5, %p1055_p4 }
   0xe   :  { %p1058_p7 = pnand %p1057_p6, %p1051_p3 }
  0x10   :  { %1061 = shalt.err (!%p1058_p7)
}
  0x11   :  { %s1139_s15 = smov 256   ;;  %s1140_s16 = smov 16  }
  0x12   :  { %33 = dma.hbm_to_vmem [thread:$0]  %s1274_s3, 8192, %s28_s28, [#allocation6], %s1139_s15, %s1139_s15, %s1140_s16  }
  0x13   :  { %s1141_s19 = smov [#allocation8]   ;;  %s1062_s23 = scalar_lea.hbm %s1276_s5, 2048 }
  0x14   :  { %s41_s20 = sshll.u32 %s1141_s19, 4  ;;  %p1063_p8 = scmp.ne.s32.totalorder %s1276_s5, %s1062_s23  ;;  %s42_s20 = int_to_ptr.vmem [resolvable:$true] %s41_s20 }
  0x15   :  { %p1066_p9 = scmp.lt.u32.totalorder %s1062_s23, %s1276_s5 }
  0x17   :  { %p1068_p10 = pnand %p1066_p9, %p1063_p8 }
  0x19   :  { %1071 = shalt.err (!%p1068_p10)
}
  0x1a   :  { %s1072_s29 = scalar_lea.vmem %s42_s20, 2048  ;;  %p1077_p12 = scmp.lt.s32.totalorder %s42_s20, %s42_s20 }
  0x1b   :  { %p1073_p11 = scmp.ne.s32.totalorder %s42_s20, %s1072_s29  ;;  %p1078_p13 = scmp.lt.s32.totalorder %s1072_s29, %s1072_s29 }
  0x1d   :  { %p1079_p0 = por %p1078_p13, %p1077_p12 }
  0x1f   :  { %p1080_p1 = pnand %p1079_p0, %p1073_p11 }
  0x21   :  { %1083 = shalt.err (!%p1080_p1)
}
  0x22   :  { %s1142_s3 = smov 128   ;;  %s1143_s28 = smov 8  }
  0x23   :  { %47 = dma.hbm_to_vmem [thread:$0]  %s1276_s5, 2048, %s42_s20, [#allocation9], %s1142_s3, %s1142_s3, %s1143_s28  }
  0x24   :  { %1130 = dma.done.wait [#allocation6], 8192  }
  0x25   :  { %1131 = vsyncadd [#allocation6], 4294959104 }
  0x26   :  { %1132 = dma.done.wait [#allocation9], 2048  }
  0x27   :  { %1133 = vsyncadd [#allocation9], 4294965248  ;;  %s810_s12 = sshll.u32 %s1271_s0, 4  ;;  %s1144_s16 = smov [#allocation2]  }
  0x28   :  { %s59_s15 = scalar_lea.hbm %s1272_s1, %s810_s12  ;;  %s67_s17 = sshll.u32 %s1144_s16, 4  ;;  %s68_s17 = int_to_ptr.vmem [resolvable:$true] %s67_s17 }
  0x29   :  { %s1084_s18 = scalar_lea.hbm %s59_s15, 16  ;;  %s1086_s5 = scalar_lea.hbm %s1272_s1, 4096 }
  0x2a   :  { %p1085_p2 = scmp.ne.s32.totalorder %s59_s15, %s1084_s18  ;;  %p1087_p3 = scmp.lt.u32.totalorder %s59_s15, %s1272_s1 }
  0x2b   :  { %p1088_p4 = scmp.lt.u32.totalorder %s1086_s5, %s1084_s18  ;;  %p1090_p6 = scmp.lt.u32.totalorder %s1084_s18, %s59_s15 }
  0x2d   :  { %p1089_p5 = por %p1088_p4, %p1087_p3 }
  0x2f   :  { %p1091_p7 = por %p1090_p6, %p1089_p5 }
  0x31   :  { %p1092_p8 = pnand %p1091_p7, %p1085_p2 }
  0x33   :  { %1095 = shalt.err (!%p1092_p8)  }
  0x34   :  { %s1096_s0 = scalar_lea.vmem %s68_s17, 16  ;;  %p1101_p10 = scmp.lt.s32.totalorder %s68_s17, %s68_s17 }
  0x35   :  { %p1097_p9 = scmp.ne.s32.totalorder %s68_s17, %s1096_s0  ;;  %p1102_p11 = scmp.lt.s32.totalorder %s1096_s0, %s1096_s0 }
  0x37   :  { %p1103_p12 = por %p1102_p11, %p1101_p10 }
  0x39   :  { %p1104_p13 = pnand %p1103_p12, %p1097_p9 }
  0x3b   :  { %1107 = shalt.err (!%p1104_p13)  }
  0x3c   :  { %70 = dma.hbm_to_vmem [thread:$0]  %s59_s15, 16, %s68_s17, [#allocation3] }
  0x3d   :  { %1134 = dma.done.wait [#allocation3], 16 }
  0x3e   :  { %1135 = vsyncadd [#allocation3], 4294967280  ;;  %v904_v0 = vld [vmem:[#allocation5 + $0x4] ss:$16 sps:$4 sm:$0xff]   ;;  %v906_v1 = vld [vmem:[#allocation5] ss:$16 sps:$4 sm:$0xff]  }
  0x3f   :  { %485 = vmatprep.subr.bf16.mxu0 %v904_v0  ;;  %v907_v2 = vld [vmem:[#allocation5 + $0x24] ss:$16 sps:$4 sm:$0xff]   ;;  %v909_v3 = vld [vmem:[#allocation5 + $0x20] ss:$16 sps:$4 sm:$0xff]   ;;  %v922_v7 = vld [vmem:[#allocation5 + $0xc] ss:$16 sps:$4 sm:$0xff]  }
  0x40   :  { %486 = vmatpush1.bf16.msra.mxu0 %v906_v1  ;;  %v910_v4 = vld [vmem:[#allocation5 + $0x44] ss:$16 sps:$4 sm:$0xff]   ;;  %v912_v5 = vld [vmem:[#allocation5 + $0x40] ss:$16 sps:$4 sm:$0xff]   ;;  %v924_v8 = vld [vmem:[#allocation5 + $0x8] ss:$16 sps:$4 sm:$0xff]   ;;  %526 = vmatprep.subr.bf16.mxu1 %v922_v7 }
  0x41   :  { %487 = vmatprep.subr.bf16.mxu0 %v907_v2  ;;  %v913_v6 = vld [vmem:[#allocation5 + $0x64] ss:$16 sps:$4 sm:$0xff]   ;;  %v915_v9 = vld [vmem:[#allocation5 + $0x60] ss:$16 sps:$4 sm:$0xff]   ;;  %527 = vmatpush1.bf16.msra.mxu1 %v924_v8  ;;  %v928_v10 = vld [vmem:[#allocation5 + $0x2c] ss:$16 sps:$4 sm:$0xff]  }
  0x42   :  { %v930_v11 = vld [vmem:[#allocation5 + $0x28] ss:$16 sps:$4 sm:$0xff]   ;;  %v916_v12 = vld [vmem:[#allocation5 + $0x84] ss:$16 sps:$4 sm:$0xff]   ;;  %528 = vmatprep.subr.bf16.mxu1 %v928_v10  ;;  %v918_v13 = vld [vmem:[#allocation5 + $0x80] ss:$16 sps:$4 sm:$0xff]  }
  0x43   :  { %v934_v14 = vld [vmem:[#allocation5 + $0x4c] ss:$16 sps:$4 sm:$0xff]   ;;  %v919_v15 = vld [vmem:[#allocation5 + $0xa4] ss:$16 sps:$4 sm:$0xff]   ;;  %v936_v16 = vld [vmem:[#allocation5 + $0x48] ss:$16 sps:$4 sm:$0xff]  }
  0x44   :  { %488 = vmatpush1.bf16.msra.mxu0 %v909_v3  ;;  %v940_v17 = vld [vmem:[#allocation5 + $0x6c] ss:$16 sps:$4 sm:$0xff]   ;;  %v921_v18 = vld [vmem:[#allocation5 + $0xa0] ss:$16 sps:$4 sm:$0xff]   ;;  %v925_v19 = vld [vmem:[#allocation5 + $0xc4] ss:$16 sps:$4 sm:$0xff]  }
  0x45   :  { %489 = vmatprep.subr.bf16.mxu0 %v910_v4  ;;  %529 = vmatpush1.bf16.msra.mxu1 %v930_v11  ;;  %v942_v20 = vld [vmem:[#allocation5 + $0x68] ss:$16 sps:$4 sm:$0xff]   ;;  %v946_v21 = vld [vmem:[#allocation5 + $0x8c] ss:$16 sps:$4 sm:$0xff]   ;;  %v927_v22 = vld [vmem:[#allocation5 + $0xc0] ss:$16 sps:$4 sm:$0xff]  }
  0x46   :  { %530 = vmatprep.subr.bf16.mxu1 %v934_v14  ;;  %v931_v23 = vld [vmem:[#allocation5 + $0xe4] ss:$16 sps:$4 sm:$0xff]   ;;  %v948_v24 = vld [vmem:[#allocation5 + $0x88] ss:$16 sps:$4 sm:$0xff]   ;;  %v952_v25 = vld [vmem:[#allocation5 + $0xac] ss:$16 sps:$4 sm:$0xff]  }
  0x47   :  { %v933_v26 = vld [vmem:[#allocation5 + $0xe0] ss:$16 sps:$4 sm:$0xff]   ;;  %v937_v27 = vld [vmem:[#allocation5 + $0x104] ss:$16 sps:$4 sm:$0xff]   ;;  %v954_v28 = vld [vmem:[#allocation5 + $0xa8] ss:$16 sps:$4 sm:$0xff]  }
  0x48   :  { %490 = vmatpush1.bf16.msra.mxu0 %v912_v5  ;;  %v958_v29 = vld [vmem:[#allocation5 + $0xcc] ss:$16 sps:$4 sm:$0xff]   ;;  %v939_v30 = vld [vmem:[#allocation5 + $0x100] ss:$16 sps:$4 sm:$0xff]   ;;  %v943_v31 = vld [vmem:[#allocation5 + $0x124] ss:$16 sps:$4 sm:$0xff]  }
  0x49   :  { %491 = vmatprep.subr.bf16.mxu0 %v913_v6  ;;  %531 = vmatpush1.bf16.msra.mxu1 %v936_v16  ;;  %v960_v32 = vld [vmem:[#allocation5 + $0xc8] ss:$16 sps:$4 sm:$0xff]   ;;  %v964_v33 = vld [vmem:[#allocation5 + $0xec] ss:$16 sps:$4 sm:$0xff]   ;;  %v945_v34 = vld [vmem:[#allocation5 + $0x120] ss:$16 sps:$4 sm:$0xff]  }
  0x4a   :  { %532 = vmatprep.subr.bf16.mxu1 %v940_v17  ;;  %v966_v35 = vld [vmem:[#allocation5 + $0xe8] ss:$16 sps:$4 sm:$0xff]   ;;  %v1232_v36 = vld [vmem:[%s1273_s2] sm:$0x1]  ;;  %v949_v37 = vld [vmem:[#allocation5 + $0x144] ss:$16 sps:$4 sm:$0xff]  }
  0x4b   :  { %v970_v38 = vld [vmem:[#allocation5 + $0x10c] ss:$16 sps:$4 sm:$0xff]   ;;  %v78_v39 = vpack.c.bf16 %v1232_v36, %v1232_v36  ;;  %v951_v40 = vld [vmem:[#allocation5 + $0x140] ss:$16 sps:$4 sm:$0xff]   ;;  %v972_v41 = vld [vmem:[#allocation5 + $0x108] ss:$16 sps:$4 sm:$0xff]  }
  0x4c   :  { %492 = vmatpush1.bf16.msra.mxu0 %v915_v9  ;;  %v955_v42 = vld [vmem:[#allocation5 + $0x164] ss:$16 sps:$4 sm:$0xff]   ;;  %v976_v43 = vld [vmem:[#allocation5 + $0x12c] ss:$16 sps:$4 sm:$0xff]   ;;  %v957_v44 = vld [vmem:[#allocation5 + $0x160] ss:$16 sps:$4 sm:$0xff]  }
  0x4d   :  { %493 = vmatprep.subr.bf16.mxu0 %v916_v12  ;;  %533 = vmatpush1.bf16.msra.mxu1 %v942_v20  ;;  %v961_v45 = vld [vmem:[#allocation5 + $0x184] ss:$16 sps:$4 sm:$0xff]   ;;  %v978_v46 = vld [vmem:[#allocation5 + $0x128] ss:$16 sps:$4 sm:$0xff]   ;;  %v982_v47 = vld [vmem:[#allocation5 + $0x14c] ss:$16 sps:$4 sm:$0xff]  }
  0x4e   :  { %534 = vmatprep.subr.bf16.mxu1 %v946_v21  ;;  %517 = vmatprep.mubr.bf16.mxu0 %v78_v39  ;;  %v963_v48 = vld [vmem:[#allocation5 + $0x180] ss:$16 sps:$4 sm:$0xff]   ;;  %v984_v49 = vld [vmem:[#allocation5 + $0x148] ss:$16 sps:$4 sm:$0xff]   ;;  %v967_v50 = vld [vmem:[#allocation5 + $0x1a4] ss:$16 sps:$4 sm:$0xff]  }
  0x4f   :  { %558 = vmatprep.mubr.bf16.mxu1 %v78_v39  ;;  %v985_v51 = vld [vmem:[#allocation5 + $0x16c] ss:$16 sps:$4 sm:$0xff]   ;;  %v969_v52 = vld [vmem:[#allocation5 + $0x1a0] ss:$16 sps:$4 sm:$0xff]   ;;  %v987_v53 = vld [vmem:[#allocation5 + $0x168] ss:$16 sps:$4 sm:$0xff]  }
  0x50   :  { %494 = vmatpush1.bf16.msra.mxu0 %v918_v13  ;;  %v973_v54 = vld [vmem:[#allocation5 + $0x1c4] ss:$16 sps:$4 sm:$0xff]   ;;  %v988_v55 = vld [vmem:[#allocation5 + $0x18c] ss:$16 sps:$4 sm:$0xff]   ;;  %v975_v56 = vld [vmem:[#allocation5 + $0x1c0] ss:$16 sps:$4 sm:$0xff]  }
  0x51   :  { %495 = vmatprep.subr.bf16.mxu0 %v919_v15  ;;  %535 = vmatpush1.bf16.msra.mxu1 %v948_v24  ;;  %v74_v57 = vld [vmem:[#allocation2] sm:$0x1]  ;;  %v990_v58 = vld [vmem:[#allocation5 + $0x188] ss:$16 sps:$4 sm:$0xff]   ;;  %v979_v59 = vld [vmem:[#allocation5 + $0x1e4] ss:$16 sps:$4 sm:$0xff]  }
  0x52   :  { %536 = vmatprep.subr.bf16.mxu1 %v952_v25  ;;  %v991_v60 = vld [vmem:[#allocation5 + $0x1ac] ss:$16 sps:$4 sm:$0xff]   ;;  %v75_v61 = vmax.f32 %v74_v57, 0.0  ;;  %v981_v62 = vld [vmem:[#allocation5 + $0x1e0] ss:$16 sps:$4 sm:$0xff]   ;;  %vm737_vm0 = vcmask 1040384  }
  0x53   :  { %v993_v63 = vld [vmem:[#allocation5 + $0x1a8] ss:$16 sps:$4 sm:$0xff]   ;;  %v994_v0 = vld [vmem:[#allocation5 + $0x1cc] ss:$16 sps:$4 sm:$0xff]  }
  0x54   :  { %496 = vmatpush1.bf16.msra.mxu0 %v921_v18  ;;  %v77_v1 = vpack.c.bf16 %v75_v61, %v75_v61  ;;  %v996_v2 = vld [vmem:[#allocation5 + $0x1c8] ss:$16 sps:$4 sm:$0xff]   ;;  %v997_v3 = vld [vmem:[#allocation5 + $0x1ec] ss:$16 sps:$4 sm:$0xff]   ;;  %v1145_v18 = vmov 0  }
  0x55   :  { %497 = vmatprep.subr.bf16.mxu0 %v925_v19  ;;  %537 = vmatpush1.bf16.msra.mxu1 %v954_v28  ;;  %v999_v4 = vld [vmem:[#allocation5 + $0x1e8] ss:$16 sps:$4 sm:$0xff]   ;;  %v1002_v5 = vld [vmem:[#allocation8 + $0x4] ss:$8 sps:$4 sm:$0xff]   ;;  %v1005_v8 = vld [vmem:[#allocation8 + $0x14] ss:$8 sps:$4 sm:$0xff]  }
  0x56   :  { %538 = vmatprep.subr.bf16.mxu1 %v958_v29  ;;  %v1000_v6 = vld [vmem:[#allocation8] ss:$8 sps:$4 sm:$0xff]   ;;  %v1003_v7 = vld [vmem:[#allocation8 + $0x10] ss:$8 sps:$4 sm:$0xff]   ;;  %v1008_v9 = vld [vmem:[#allocation8 + $0x24] ss:$8 sps:$4 sm:$0xff]  }
  0x57   :  { %v1006_v10 = vld [vmem:[#allocation8 + $0x20] ss:$8 sps:$4 sm:$0xff]   ;;  %v1011_v11 = vld [vmem:[#allocation8 + $0x34] ss:$8 sps:$4 sm:$0xff]   ;;  %v1009_v12 = vld [vmem:[#allocation8 + $0x30] ss:$8 sps:$4 sm:$0xff]  }
  0x58   :  { %498 = vmatpush1.bf16.msra.mxu0 %v927_v22  ;;  %v1014_v13 = vld [vmem:[#allocation8 + $0x44] ss:$8 sps:$4 sm:$0xff]   ;;  %v1012_v14 = vld [vmem:[#allocation8 + $0x40] ss:$8 sps:$4 sm:$0xff]   ;;  %v1017_v15 = vld [vmem:[#allocation8 + $0x54] ss:$8 sps:$4 sm:$0xff]   ;;  %v465_v22 = vlaneseq }
  0x59   :  { %499 = vmatprep.subr.bf16.mxu0 %v931_v23  ;;  %539 = vmatpush1.bf16.msra.mxu1 %v960_v32  ;;  %v1015_v16 = vld [vmem:[#allocation8 + $0x50] ss:$8 sps:$4 sm:$0xff]   ;;  %v1020_v17 = vld [vmem:[#allocation8 + $0x64] ss:$8 sps:$4 sm:$0xff]   ;;  %v1018_v19 = vld [vmem:[#allocation8 + $0x60] ss:$8 sps:$4 sm:$0xff]  }
  0x5a   :  { %540 = vmatprep.subr.bf16.mxu1 %v964_v33  ;;  %v1023_v20 = vld [vmem:[#allocation8 + $0x74] ss:$8 sps:$4 sm:$0xff]   ;;  %v1021_v21 = vld [vmem:[#allocation8 + $0x70] ss:$8 sps:$4 sm:$0xff]   ;;  %v1237_v23 = vshrl.u32 %v465_v22, 7  ;;  %vm779_vm1 = vcmp.lt.s32.totalorder %v465_v22, 256 }
  0x5b   :  { %v143_v25 = vld [vmem:[%s1275_s4] sm:$0xf] }
  0x5c   :  { %500 = vmatpush1.bf16.msra.mxu0 %v933_v26  ;;  %v467_v24 = vsub.s32 0, %v1237_v23  ;;  %v471_v26 = vsub.s32 1, %v1237_v23 }
  0x5d   :  { %501 = vmatprep.subr.bf16.mxu0 %v937_v27  ;;  %541 = vmatpush1.bf16.msra.mxu1 %v966_v35 }
  0x5e   :  { %542 = vmatprep.subr.bf16.mxu1 %v970_v38  ;;  %v468_v27 = vrot.slane %v143_v25, %v467_v24  ;;  %v472_v29 = vrot.slane %v143_v25, %v471_v26 }
  0x60   :  { %502 = vmatpush1.bf16.msra.mxu0 %v939_v30 }
  0x61   :  { %503 = vmatprep.subr.bf16.mxu0 %v943_v31  ;;  %543 = vmatpush1.bf16.msra.mxu1 %v972_v41 }
  0x62   :  { %544 = vmatprep.subr.bf16.mxu1 %v976_v43 }
  0x64   :  { %504 = vmatpush1.bf16.msra.mxu0 %v945_v34 }
  0x65   :  { %505 = vmatprep.subr.bf16.mxu0 %v949_v37  ;;  %545 = vmatpush1.bf16.msra.mxu1 %v978_v46 }
  0x66   :  { %546 = vmatprep.subr.bf16.mxu1 %v982_v47 }
  0x68   :  { %506 = vmatpush1.bf16.msra.mxu0 %v951_v40 }
  0x69   :  { %507 = vmatprep.subr.bf16.mxu0 %v955_v42  ;;  %547 = vmatpush1.bf16.msra.mxu1 %v984_v49 }
  0x6a   :  { %548 = vmatprep.subr.bf16.mxu1 %v985_v51 }
  0x6c   :  { %508 = vmatpush1.bf16.msra.mxu0 %v957_v44  ;;  %v479_v44 = vsub.s32 3, %v1237_v23 }
  0x6d   :  { %509 = vmatprep.subr.bf16.mxu0 %v961_v45  ;;  %549 = vmatpush1.bf16.msra.mxu1 %v987_v53  ;;  %v475_v45 = vsub.s32 2, %v1237_v23 }
  0x6e   :  { %550 = vmatprep.subr.bf16.mxu1 %v988_v55  ;;  %v480_v46 = vrot.slane %v143_v25, %v479_v44 }
  0x6f   :  { %v476_v49 = vrot.slane %v143_v25, %v475_v45 }
  0x70   :  { %510 = vmatpush1.bf16.msra.mxu0 %v963_v48 }
  0x71   :  { %511 = vmatprep.subr.bf16.mxu0 %v967_v50  ;;  %551 = vmatpush1.bf16.msra.mxu1 %v990_v58 }
  0x72   :  { %552 = vmatprep.subr.bf16.mxu1 %v991_v60 }
  0x74   :  { %512 = vmatpush1.bf16.msra.mxu0 %v969_v52 }
  0x75   :  { %513 = vmatprep.subr.bf16.mxu0 %v973_v54  ;;  %553 = vmatpush1.bf16.msra.mxu1 %v993_v63 }
  0x76   :  { %554 = vmatprep.subr.bf16.mxu1 %v994_v0 }
  0x78   :  { %514 = vmatpush1.bf16.msra.mxu0 %v975_v56 }
  0x79   :  { %515 = vmatprep.subr.bf16.mxu0 %v979_v59  ;;  %555 = vmatpush1.bf16.msra.mxu1 %v996_v2 }
  0x7a   :  { %556 = vmatprep.subr.bf16.mxu1 %v997_v3 }
  0x7c   :  { %516 = vmatpush1.bf16.msra.mxu0 %v981_v62  ;;  %v604_v62 = vld [vmem:[%s1277_s6] sm:$0x3]  ;;  %s1147_s6 = smov [#allocation10]  }
  0x7d   :  { %557 = vmatpush1.bf16.msra.mxu1 %v999_v4  ;;  %696 = vmatprep.subr.bf16.mxu0 %v1002_v5  ;;  %v689_v63 = vrot.slane %v604_v62, %v467_v24  ;;  %v693_v0 = vrot.slane %v604_v62, %v471_v26 }
  0x7f   :  { %518 = vmatmul.mubr.bf16.vlgmr.msra.gmra.mrb[0].mxu0 %v77_v1 }
  0x80   :  { %559 = vmatmul.mubr.bf16.vlgmr.msra.gmra.mrb[0].mxu1 %v77_v1  ;;  %697 = vmatpush1.bf16.msra.mxu0 %v1000_v6 }
  0x81   :  { %698 = vmatprep.subr.bf16.mxu0 %v1005_v8  ;;  %728 = vmatprep.mubr.bf16.mxu0 %v1145_v18 }
  0x84   :  { %699 = vmatpush1.bf16.msra.mxu0 %v1003_v7 }
  0x85   :  { %700 = vmatprep.subr.bf16.mxu0 %v1008_v9 }
  0x88   :  { %701 = vmatpush1.bf16.msra.mxu0 %v1006_v10 }
  0x89   :  { %702 = vmatprep.subr.bf16.mxu0 %v1011_v11 }
  0x8c   :  { %703 = vmatpush1.bf16.msra.mxu0 %v1009_v12 }
  0x8d   :  { %704 = vmatprep.subr.bf16.mxu0 %v1014_v13 }
  0x90   :  { %705 = vmatpush1.bf16.msra.mxu0 %v1012_v14 }
  0x91   :  { %706 = vmatprep.subr.bf16.mxu0 %v1017_v15 }
  0x94   :  { %707 = vmatpush1.bf16.msra.mxu0 %v1015_v16 }
  0x95   :  { %708 = vmatprep.subr.bf16.mxu0 %v1020_v17 }
  0x98   :  { %709 = vmatpush1.bf16.msra.mxu0 %v1018_v19 }
  0x99   :  { %710 = vmatprep.subr.bf16.mxu0 %v1023_v20  ;;  %v1146_v20 = vmov 1966171168  }
  0x9c   :  { %711 = vmatpush1.bf16.msra.mxu0 %v1021_v21  ;;  %v763_v21 = vunpack.c.l.s4 %v1146_v20 }
  0x9e   :  { %v764_v26 = vunpack.c.0.s8 %v763_v21 }
 0x152   :  { %v519_v28 = vpop.f32.mrb[0].mxu0 }
 0x153   :  { %v520_v30 = vadd.f32 %v519_v28, %v468_v27  ;;  %v521_v31 = vpop.f32.mrb[1].mxu0  ;;  %v560_v38 = vpop.f32.mrb[0].mxu1 }
 0x154   :  { %v523_v32 = vpop.f32.mrb[2].mxu0  ;;  %v522_v35 = vadd.f32 %v521_v31, %v472_v29  ;;  %v562_v39 = vpop.f32.mrb[1].mxu1  ;;  %v561_v52 = vadd.f32 %v560_v38, %v476_v49 }
 0x155   :  { %v875_v33 = vmul.f32 -1.442695, %v520_v30  ;;  %v524_v34 = vpop.f32.mrb[3].mxu0  ;;  %v564_v40 = vpop.f32.mrb[2].mxu1  ;;  %v563_v50 = vadd.f32 %v562_v39, %v480_v46  ;;  %v767_v30 = vsub.s32 %v764_v26, %v1237_v23 }
 0x156   :  { %v876_v37 = vmul.f32 -1.442695, %v522_v35  ;;  %v565_v41 = vpop.f32.mrb[3].mxu1 }
 0x157   :  { %1024 = vpow2.f32 %v875_v33 }
 0x158   :  { %1026 = vpow2.f32 %v876_v37 }
 0x161   :  { %v1025_v42 = vpop.eup %1024 }
 0x162   :  { %v573_v43 = vadd.f32 1.0, %v1025_v42  ;;  %v1027_v47 = vpop.eup %1026 }
 0x163   :  { %v574_v48 = vadd.f32 1.0, %v1027_v47 }
 0x164   :  { %1028 = vrcp.f32 %v573_v43 }
 0x165   :  { %1030 = vrcp.f32 %v574_v48 }
 0x16e   :  { %v1029_v51 = vpop.eup %1028 }
 0x16f   :  { %v579_v53 = vmul.f32 %v1029_v51, %v563_v50  ;;  %v1031_v55 = vpop.eup %1030 }
 0x170   :  { %v582_v56 = vsub.f32 1.0, %v1031_v55  ;;  %v584_v59 = vmul.f32 %v1031_v55, %v1232_v36 }
 0x171   :  { %v580_v54 = vadd.f32 %v579_v53, %v561_v52 }
 0x173   :  { %1032 = vtanh.f32 %v580_v54 }
 0x17d   :  { %v1033_v57 = vpop.eup %1032 }
 0x17e   :  { %v583_v58 = vmul.f32 %v1033_v57, %v582_v56 }
 0x180   :  { %v585_v60 = vadd.f32 %v584_v59, %v583_v58 }
 0x182   :  { %586 = vst [vmem:[%s1279_s8] sm:$0x1] %v585_v60  ;;  %v587_v61 = vpack.c.bf16 %v585_v60, %v585_v60  ;;  %s788_s8 = sshll.u32 %s1147_s6, 4  ;;  %s789_s8 = int_to_ptr.vmem [resolvable:$true] %s788_s8 }
 0x183   :  { %s1108_s29 = scalar_lea.vmem %s789_s8, 32  ;;  %p1113_p1 = scmp.lt.s32.totalorder %s789_s8, %s789_s8 }
 0x184   :  { %729 = vmatmul.mubr.bf16.vlgmr.msra.gmra.mrb[4].mxu0 %v587_v61  ;;  %p1109_p0 = scmp.ne.s32.totalorder %s789_s8, %s1108_s29  ;;  %p1114_p2 = scmp.lt.s32.totalorder %s1108_s29, %s1108_s29 }
 0x186   :  { %p1115_p3 = por %p1114_p2, %p1113_p1 }
 0x188   :  { %p1116_p4 = pnand %p1115_p3, %p1109_p0 }
 0x257   :  { %v730_v1 = vpop.f32.mrb[4].mxu0 }
 0x258   :  { %v731_v2 = vadd.f32 %v730_v1, %v689_v63  ;;  %v732_v3 = vpop.f32.mrb[5].mxu0 }
 0x259   :  { %v733_v4 = vadd.f32 %v732_v3, %v693_v0  ;;  %v734_v5 = vpop.f32.mrb[6].mxu0 }
 0x25a   :  { %v735_v36 = vpop.f32.mrb[7].mxu0  ;;  %v738_v6 = vsel %vm737_vm0, %v731_v2, -inf }
 0x25b   :  { %v739_v7 = vsel %vm737_vm0, %v733_v4, -inf }
 0x25c   :  { %v740_v8 = vmax.f32 %v738_v6, %v739_v7 }
 0x25e   :  { %741 = vmax.xlane.f32.xlu0 %v740_v8 }
 0x2eb   :  { %v742_v9 = vpop.xlane.xlu0 %741 }
 0x2ec   :  { %v743_v10 = vsub.f32 %v731_v2, %v742_v9  ;;  %v744_v11 = vsub.f32 %v733_v4, %v742_v9 }
 0x2ee   :  { %v745_v12 = vmul.f32 1.442695, %v743_v10  ;;  %v747_v13 = vmul.f32 1.442695, %v744_v11 }
 0x2f0   :  { %1034 = vpow2.f32 %v745_v12 }
 0x2f1   :  { %1036 = vpow2.f32 %v747_v13 }
 0x2fa   :  { %v1035_v14 = vpop.eup %1034 }
 0x2fb   :  { %v1037_v15 = vpop.eup %1036  ;;  %v749_v16 = vsel %vm737_vm0, %v1035_v14, 0.0 }
 0x2fc   :  { %v750_v17 = vsel %vm737_vm0, %v1037_v15, 0.0 }
 0x2fd   :  { %v751_v18 = vadd.f32 %v750_v17, %v749_v16 }
 0x2ff   :  { %752 = vadd.xlane.f32.xlu0 %v751_v18 }
 0x38c   :  { %v753_v19 = vpop.xlane.xlu0 %752 }
 0x38d   :  { %1038 = vlog2.f32 %v753_v19 }
 0x397   :  { %v1039_v24 = vpop.eup %1038 }
 0x398   :  { %v755_v25 = vmul.f32 0.6931472, %v1039_v24 }
 0x39a   :  { %v756_v27 = vadd.f32 %v755_v25, %v742_v9 }
 0x39c   :  { %v757_v28 = vsub.f32 %v731_v2, %v756_v27  ;;  %v758_v29 = vsub.f32 %v733_v4, %v756_v27 }
 0x39e   :  { %v761_v31 = vcombine.low %v757_v28, %v758_v29 }
 0x3a0   :  { %v768_v32 = vrot.slane %v761_v31, %v767_v30 }
 0x3a2   :  { %v775_v33 = vrot.slane %v768_v32, %v767_v30 }
 0x3a4   :  { %781 = vst.msk [vmem:[#allocation10] sm:$0x3] %vm779_vm1, %v775_v33 }
 0x3a5   :  { %1119 = shalt.err (!%p1116_p4)
}
 0x3a6   :  { %s1120_s30 = scalar_lea.hbm %s1278_s7, 32 }
 0x3a7   :  { %p1121_p5 = scmp.ne.s32.totalorder %s1278_s7, %s1120_s30  ;;  %p1124_p6 = scmp.lt.u32.totalorder %s1120_s30, %s1278_s7 }
 0x3a9   :  { %p1126_p7 = pnand %p1124_p6, %p1121_p5 }
 0x3ab   :  { %1129 = shalt.err (!%p1126_p7)
}
 0x3ac   :  { %791 = dma.vmem_to_hbm [thread:$0]  %s789_s8, 32, %s1278_s7, [#allocation7]  }
 0x3ad   :  { %1136 = dma.done.wait [#allocation7], 32  }
 0x3ae   :  { %1137 = vsyncadd [#allocation7], 4294967264 }
 0x3af   :  { %799 = vsyncpa [#allocation6], 1 }
 0x3b0   :  { %800 = vsyncpa [#allocation9], 1 }
 0x3b1   :  { %801 = vsyncpa [#allocation7], 1 }
 0x3b2   :  { %802 = vsyncmov [#allocation3] }
 0x3b5   :  { %s803_s15 = vpop.sfrf %802 }
 0x3b6   :  { %p893_p8 = scmp.ne.s32.totalorder %s803_s15, 0 }
 0x3b8   :  { %807 = shalt.err (%p893_p8)  }

</bundles_post_ra>
